<compile_context>
chip_gen: v7x
topology: tpu7x:2x2x1
jax: 0.10.0
libtpu: 0.0.40
codegen_flags: <defaults>
</compile_context>

<pallas_src>
import functools
import math

import jax
import jax.numpy as jnp
from jax.experimental import pallas as pl
from jax.experimental.pallas import tpu as pltpu

TAU = 2.0      # LIFNode default tau
V_TH = 1.0     # LIFNode default v_threshold
DECAY = 0.99
EPSILON = 1e-5

ROW_TILE = 256                       # modest row tile (v5e vst-bound LIF; v7x VMEM budget)
VMEM_LIMIT = 32 * 1024 * 1024        # explicit; safe on v7x (64 MiB physical / 32 MiB scoped)
SENTINEL = 1e30                      # |e_k|^2 for padded codebook entries (never wins argmin)


def _round_up(x, m):
    return ((x + m - 1) // m) * m


def _row_tiling(n):
    """Row tile (multiple of 8, <= ROW_TILE) and padded row count (multiple of tile)."""
    n8 = _round_up(max(n, 1), 8)
    tile = min(n8, ROW_TILE)
    n_pad = _round_up(n8, tile)
    return tile, n_pad


def _pad2(a, rows, cols):
    r, c = a.shape
    return jnp.pad(a, ((0, rows - r), (0, cols - c)))


# --------------------------------------------------------------------------------------
# In-kernel spiking-MLP compute (shared by both kernels); weights come from ONE packed slab
# --------------------------------------------------------------------------------------
def _spike_mlp_from_slab(x, w_ref, *, din_pad, hidden_pad, dout_pad, T):
    """Linear -> LIF -> Linear -> LIF -> Linear -> LIF -> Linear, T steps, mean over T.

    The input is identical at every time step, so layer 1 is one matmul; every subsequent
    layer's matmul is batched over all T steps (rows = T*n); only the elementwise LIF
    membrane recurrence is sequential over T.  Spikes/currents live in a (T, n, H)
    leading-axis layout; (T, n, H) <-> (T*n, H) reshapes are free since n % 8 == 0.
    """
    n = x.shape[0]
    inv_tau = 1.0 / TAU

    # Static-offset slices of the packed weight slab (all offsets multiples of 8; all
    # column widths multiples of 128) -- one DMA brought the whole slab in.
    o = 0
    w1 = w_ref[o:o + din_pad, 0:hidden_pad];    o += din_pad
    b1 = w_ref[o:o + 1, 0:hidden_pad];          o += 8
    w2 = w_ref[o:o + hidden_pad, 0:hidden_pad]; o += hidden_pad
    b2 = w_ref[o:o + 1, 0:hidden_pad];          o += 8
    w3 = w_ref[o:o + hidden_pad, 0:hidden_pad]; o += hidden_pad
    b3 = w_ref[o:o + 1, 0:hidden_pad];          o += 8
    w4 = w_ref[o:o + hidden_pad, 0:dout_pad];   o += hidden_pad
    b4 = w_ref[o:o + 1, 0:dout_pad]

    def lif_steps(currents):
        # currents: length-T list of (n, H) input currents -> (T, n, H) spikes.
        v = jnp.zeros_like(currents[0])
        spikes = []
        for h in currents:
            v = v + (h - v) * inv_tau                  # charge (decay_input=True, v_reset=0)
            s = (v >= V_TH).astype(jnp.float32)        # fire (Heaviside forward)
            v = v * (1.0 - s)                          # hard reset to 0
            spikes.append(s)
        return jnp.stack(spikes, axis=0)

    # layer 1: same input every step -> one matmul, LIF driven by a constant current
    h1 = jnp.dot(x, w1, preferred_element_type=jnp.float32) + b1                  # (n, H)
    s1 = lif_steps([h1] * T).reshape(T * n, hidden_pad)                           # (T*n, H)
    # layers 2/3: ONE batched matmul over all T steps, then sequential elementwise LIF
    h2 = (jnp.dot(s1, w2, preferred_element_type=jnp.float32) + b2).reshape(T, n, hidden_pad)
    s2 = lif_steps([h2[t] for t in range(T)]).reshape(T * n, hidden_pad)
    h3 = (jnp.dot(s2, w3, preferred_element_type=jnp.float32) + b3).reshape(T, n, hidden_pad)
    s3 = lif_steps([h3[t] for t in range(T)]).reshape(T * n, hidden_pad)
    # layer 4: one batched matmul, mean over T (leading-axis reduction, no row slicing)
    o4 = (jnp.dot(s3, w4, preferred_element_type=jnp.float32) + b4).reshape(T, n, dout_pad)
    return jnp.sum(o4, axis=0) * (1.0 / T)                                        # (n, dout_pad)


# --------------------------------------------------------------------------------------
# Pallas kernels
# --------------------------------------------------------------------------------------
def enc_vq_kernel(x_ref, w_ref, emb_ref, encx_ref, idx_ref, *,
                  T, din_pad, hidden_pad, co_pad):
    """enc spiking MLP fused with the VQ nearest-code (argmin) search; lane-dense outputs."""
    enc_x = _spike_mlp_from_slab(x_ref[...], w_ref, din_pad=din_pad,
                                 hidden_pad=hidden_pad, dout_pad=co_pad, T=T)
    encx_ref[...] = enc_x                                              # (tile, 128) unmasked

    et = emb_ref[0:co_pad, :]                                          # (co_pad, K_pad)
    e2 = emb_ref[co_pad:co_pad + 1, :]                                 # (1, K_pad), sentinel-padded
    # distances = |x|^2 + |e_k|^2 - 2 x.e_k ; argmin with first-min tie break (torch.argmin)
    x2 = jnp.sum(enc_x * enc_x, axis=1, keepdims=True)                 # padded cols are 0 -> exact
    d = x2 + e2 - 2.0 * jnp.dot(enc_x, et, preferred_element_type=jnp.float32)
    min_d = jnp.min(d, axis=1, keepdims=True)
    ids = jax.lax.broadcasted_iota(jnp.int32, d.shape, 1)
    big = jnp.int32(2 ** 31 - 1)
    idx = jnp.min(jnp.where(d <= min_d, ids, big), axis=1, keepdims=True)   # (tile, 1)
    idx_ref[...] = jnp.broadcast_to(idx, idx_ref.shape)                # 128-lane unmasked store


def fused_mlps_kernel(x_ref, w_ref, out_ref, *, T, din_pad, hidden_pad, dout_pad):
    """One spiking MLP per outer grid step (dec_obs / act / transi_e); inner axis = row tile."""
    out_ref[...] = _spike_mlp_from_slab(x_ref[...], w_ref, din_pad=din_pad,
                                        hidden_pad=hidden_pad, dout_pad=dout_pad, T=T)


# --------------------------------------------------------------------------------------
# pallas_call wrappers
# --------------------------------------------------------------------------------------
def enc_with_vq(x, enc_slab, emb_slab, enc_meta, T):
    """Returns (enc_x (n, context_dim), idx (n,) int32)."""
    n = x.shape[0]
    din_pad = enc_meta["din_pad"]
    hidden_pad = enc_meta["hidden_pad"]
    co_pad = enc_meta["co_pad"]
    context_dim = enc_meta["context_dim"]

    tile, n_pad = _row_tiling(n)
    xp = _pad2(x.astype(jnp.float32), n_pad, din_pad)
    n_tiles = n_pad // tile

    encx, idx = pl.pallas_call(
        functools.partial(enc_vq_kernel, T=T, din_pad=din_pad,
                          hidden_pad=hidden_pad, co_pad=co_pad),
        out_shape=(jax.ShapeDtypeStruct((n_pad, co_pad), jnp.float32),
                   jax.ShapeDtypeStruct((n_pad, 128), jnp.int32)),
        grid=(n_tiles,),
        in_specs=[pl.BlockSpec((tile, din_pad), lambda r: (r, 0)),
                  pl.BlockSpec(enc_slab.shape, lambda r: (0, 0)),
                  pl.BlockSpec(emb_slab.shape, lambda r: (0, 0))],
        out_specs=(pl.BlockSpec((tile, co_pad), lambda r: (r, 0)),
                   pl.BlockSpec((tile, 128), lambda r: (r, 0))),
        compiler_params=pltpu.CompilerParams(
            dimension_semantics=("parallel",),
            vmem_limit_bytes=VMEM_LIMIT),
    )(xp, enc_slab, emb_slab)
    return encx[:n, :context_dim], idx[:n, 0]


def fused_spike_mlps(xs, w_slabs, fused_meta, T, tile):
    """xs: (M, n_pad, din_pad). All M spiking MLPs in one call; grid = (M, row tiles)."""
    M, n_pad, din_pad = xs.shape
    hidden_pad = fused_meta["hidden_pad"]
    dout_pad = fused_meta["dout_pad"]
    n_tiles = n_pad // tile

    return pl.pallas_call(
        functools.partial(fused_mlps_kernel, T=T, din_pad=din_pad,
                          hidden_pad=hidden_pad, dout_pad=dout_pad),
        out_shape=jax.ShapeDtypeStruct((M, n_pad, dout_pad), jnp.float32),
        grid=(M, n_tiles),
        in_specs=[pl.BlockSpec((None, tile, din_pad), lambda m, r: (m, r, 0)),
                  pl.BlockSpec((None,) + tuple(w_slabs.shape[1:]), lambda m, r: (m, 0, 0))],
        out_specs=pl.BlockSpec((None, tile, dout_pad), lambda m, r: (m, r, 0)),
        # Both axes "parallel" -> sharded across v7x's 2 TensorCores; harmless on v5e/v6e.
        compiler_params=pltpu.CompilerParams(
            dimension_semantics=("parallel", "parallel"),
            vmem_limit_bytes=VMEM_LIMIT),
    )(xs, w_slabs)


# --------------------------------------------------------------------------------------
# Parameter construction (deterministic; mirrors TrajEncoderSpike.__init__ shapes)
# --------------------------------------------------------------------------------------
def _linear(key, din, dout):
    k1, k2 = jax.random.split(key)
    bound = 1.0 / math.sqrt(din)
    w = jax.random.uniform(k1, (din, dout), jnp.float32, -bound, bound)
    b = jax.random.uniform(k2, (1, dout), jnp.float32, -bound, bound)
    return w, b


def _mlp4(key, din, hidden, dout):
    ks = jax.random.split(key, 4)
    w1, b1 = _linear(ks[0], din, hidden)
    w2, b2 = _linear(ks[1], hidden, hidden)
    w3, b3 = _linear(ks[2], hidden, hidden)
    w4, b4 = _linear(ks[3], hidden, dout)
    return (w1, b1, w2, b2, w3, b3, w4, b4)


def _pack_mlp_slab(mlp, din_pad, hidden_pad, dout_pad):
    """One contiguous, 8/128-aligned weight+bias slab: [w1; b1; w2; b2; w3; b3; w4; b4]."""
    width = max(hidden_pad, dout_pad)
    w1, b1, w2, b2, w3, b3, w4, b4 = mlp
    segs = [_pad2(w1, din_pad, width), _pad2(b1, 8, width),
            _pad2(w2, hidden_pad, width), _pad2(b2, 8, width),
            _pad2(w3, hidden_pad, width), _pad2(b3, 8, width),
            _pad2(w4, hidden_pad, width), _pad2(b4, 8, width)]
    return jnp.concatenate(segs, axis=0)


def _make_vq_cache(embeddings, K_pad, co_pad):
    """Packed VQ slab: rows [0:co_pad) = codebook^T (zero-padded); row co_pad = |e_k|^2
    with SENTINEL for padded codes (so they can never win the argmin)."""
    K, D = embeddings.shape
    et = jnp.zeros((co_pad, K_pad), jnp.float32).at[:D, :K].set(embeddings.T)
    e2 = jnp.full((K_pad,), SENTINEL, jnp.float32).at[:K].set(
        jnp.sum(embeddings * embeddings, axis=1))
    tail = jnp.zeros((8, K_pad), jnp.float32).at[0].set(e2)
    return jnp.concatenate([et, tail], axis=0)


def make_params(key, horizon, context_dim, obs_dim, act_dim,
                embt_dim, num_embeddings, hidden_size, ensemble_num):
    K = num_embeddings * (horizon - 1)
    keys = jax.random.split(key, 6 + ensemble_num)

    # xavier_uniform codebook
    a = math.sqrt(6.0 / (K + context_dim))
    embeddings = jax.random.uniform(keys[0], (K, context_dim), jnp.float32, -a, a)

    enc_din = horizon * (obs_dim + 1)
    enc = _mlp4(keys[1], enc_din, hidden_size, context_dim)
    dec_obs = _mlp4(keys[2], context_dim + embt_dim + obs_dim + 1, hidden_size, obs_dim + 1)
    act = _mlp4(keys[3], obs_dim * 2, hidden_size, act_dim)
    dec_t = jax.random.normal(keys[4], (horizon + 1, embt_dim), jnp.float32)
    transi = [_mlp4(keys[5 + i], obs_dim + act_dim + 1, hidden_size, obs_dim + 1)
              for i in range(ensemble_num)]

    hidden_pad = _round_up(hidden_size, 128)        # padded LIF units get 0 current -> never fire
    co_pad = _round_up(context_dim, 128)
    K_pad = _round_up(K, 128)

    # ---- enc + VQ packed slabs ----
    enc_din_pad = _round_up(enc_din, 8)
    enc_slab = _pack_mlp_slab(enc, enc_din_pad, hidden_pad, co_pad)
    emb_slab = _make_vq_cache(embeddings, K_pad, co_pad)
    enc_meta = {"din": enc_din, "din_pad": enc_din_pad, "hidden_pad": hidden_pad,
                "co_pad": co_pad, "context_dim": context_dim}

    # ---- dec_obs / act / transi ensemble: pre-packed, zero-padded weight slabs ----
    slots = [("dec_obs", context_dim + embt_dim + obs_dim + 1, obs_dim + 1),
             ("act", obs_dim * 2, act_dim)] + \
            [("transi%d" % i, obs_dim + act_dim + 1, obs_dim + 1) for i in range(ensemble_num)]
    din_pad = _round_up(max(d for _, d, _ in slots), 8)
    dout_pad = _round_up(max(d for _, _, d in slots), 128)  # lane-dense output slab
    mlps = [dec_obs, act] + transi
    fused_slabs = jnp.stack([_pack_mlp_slab(m, din_pad, hidden_pad, dout_pad) for m in mlps], 0)
    fused_meta = {"slots": slots, "din_pad": din_pad, "hidden_pad": hidden_pad,
                  "dout_pad": dout_pad}

    params = {
        "enc_slab": enc_slab,
        "dec_t": dec_t,
        "embeddings": embeddings,     # (K, D) unpadded (quantize / EMA)
        "emb_slab": emb_slab,         # packed codebook^T + |e_k|^2 cache
        "fused_slabs": fused_slabs,   # (M, R, width)
    }
    state = {
        "cs_hidden": jnp.zeros((K,), jnp.float32), "cs_counter": 0,
        "dw_hidden": jnp.zeros((K, context_dim), jnp.float32), "dw_counter": 0,
    }
    return params, enc_meta, fused_meta, state


def _ema(hidden, counter, value):
    counter = counter + 1
    hidden = hidden - (hidden - value) * (1.0 - DECAY)
    average = hidden / (1.0 - DECAY ** counter)
    return hidden, counter, average


# --------------------------------------------------------------------------------------
# Forward pass (mirrors TrajEncoderSpike.forward)
# --------------------------------------------------------------------------------------
def traj_encoder_spike_forward(params, enc_meta, fused_meta, state, inputx, inputts, *,
                               horizon, obs_dim, T,
                               conp=True, obsp=True, actp=True, transip=True):
    B = inputx.shape[0]
    con, loss, enc_x, obs, act = None, 0.0, None, None, None
    transiss = []
    embeddings = params["embeddings"]
    new_state = dict(state)

    if conp:
        xpt = jnp.concatenate([inputx[:, :, :obs_dim], inputx[:, :, -1:]], axis=-1)
        x = xpt.reshape(B, horizon * (obs_dim + 1))
        # Pallas call #1: enc spiking MLP + VQ argmin fused (lane-dense outputs)
        enc_x, idx = enc_with_vq(x, params["enc_slab"], params["emb_slab"], enc_meta, T)
        quantized = jnp.take(embeddings, idx, axis=0)                 # old codebook (as in torch)

        # --- codebook EMA buffer update (affects the NEXT forward; caller must thread
        #     new_state["embeddings"/"emb_slab"] back into params) ---
        K = embeddings.shape[0]
        encodings = jax.nn.one_hot(idx, K, dtype=jnp.float32)
        cs_h, cs_c, upd_cs = _ema(state["cs_hidden"], state["cs_counter"],
                                  jnp.sum(encodings, axis=0))
        nsum = jnp.sum(upd_cs)
        upd_cs = (upd_cs + EPSILON) / (nsum + K * EPSILON) * nsum
        dw = encodings.T @ enc_x
        dw_h, dw_c, upd_dw = _ema(state["dw_hidden"], state["dw_counter"], dw)
        new_emb = upd_dw / upd_cs[:, None]
        K_pad = params["emb_slab"].shape[1]
        new_state.update(cs_hidden=cs_h, cs_counter=cs_c, dw_hidden=dw_h, dw_counter=dw_c,
                         embeddings=new_emb,
                         emb_slab=_make_vq_cache(new_emb, K_pad, enc_meta["co_pad"]))

        loss = jnp.mean((enc_x - quantized) ** 2)                     # e_latent_loss
        con = enc_x + jax.lax.stop_gradient(quantized - enc_x)        # straight-through

    # ---- dec_obs / act / transi ensemble: ONE fused pallas_call over ACTIVE heads only ----
    slots_all = fused_meta["slots"]
    active = [i for i, (name, _d, _o) in enumerate(slots_all)
              if (name == "dec_obs" and obsp) or (name == "act" and actp) or
                 (name.startswith("transi") and transip)]

    if active:
        din_pad = fused_meta["din_pad"]
        xs_list, row_counts = [], []
        for i in active:
            name, _din, _dout = slots_all[i]
            if name == "dec_obs":
                assert conp
                # TODO(synk): for large B*horizon, avoid materializing the horizon-repeated
                # con/xi0 slabs in HBM (broadcast inside the kernel instead); fine at small B.
                xr = jnp.repeat(con[:, None, :], horizon, axis=1)                 # (B, H, C)
                t_idx = jnp.maximum(inputts - inputts[:, :1] + 1, 0)
                ts = jnp.take(params["dec_t"], t_idx, axis=0)                     # (B, H, embt)
                xi0 = jnp.concatenate([inputx[:, :1, :obs_dim], inputx[:, :1, -1:]], axis=-1)
                xi0 = jnp.repeat(xi0, horizon, axis=1)                            # (B, H, obs+1)
                x_slot = jnp.concatenate([xr, ts, xi0], axis=-1).reshape(B * horizon, -1)
            elif name == "act":
                ax = jnp.concatenate([inputx[:, :-1, :obs_dim], inputx[:, 1:, :obs_dim]], axis=-1)
                x_slot = ax.reshape(B * (horizon - 1), -1)
            else:  # transi ensemble member
                x_slot = inputx.reshape(B * horizon, -1)
            xs_list.append(x_slot.astype(jnp.float32))
            row_counts.append(x_slot.shape[0])

        tile, n_pad = _row_tiling(max(row_counts))
        xs = jnp.stack([_pad2(xl, n_pad, din_pad) for xl in xs_list], axis=0)     # (M_act, n_pad, din_pad)
        w_slabs = params["fused_slabs"]
        if len(active) != len(slots_all):
            w_slabs = w_slabs[jnp.asarray(active, dtype=jnp.int32)]

        # Pallas call #2: all active spiking MLPs in one kernel (grid = (M_act, row tiles))
        out = fused_spike_mlps(xs, w_slabs, fused_meta, T, tile)                  # (M_act, n_pad, 128)

        for pos, i in enumerate(active):
            name, _din, dout = slots_all[i]
            if name == "dec_obs":
                obs = out[pos, :B * horizon, :dout].reshape(B, horizon, dout)
            elif name == "act":
                act = out[pos, :B * (horizon - 1), :dout].reshape(B, horizon - 1, dout)
            else:
                transiss.append(out[pos, :B * horizon, :dout].reshape(B, horizon, dout))

    # functional.reset_net(self): membrane state is local to each kernel call (starts at 0),
    # so the reset is implicit.
    return (con, loss, obs, act, transiss, enc_x), new_state


# --------------------------------------------------------------------------------------
if __name__ == "__main__":
    horizon = 4
    obs_dim = 7
    act_dim = 3
    transition_dim = obs_dim + act_dim + 1          # transi_model input dim
    context_dim = 16
    embt_dim = 5
    num_embeddings = 64                             # codebook = 64 * (horizon-1) = 192 (-> 256 padded)
    hidden_size = 32
    ensemble_num = 1
    T = 4
    B = 2

    key = jax.random.PRNGKey(0)
    kp, kx = jax.random.split(key, 2)
    params, enc_meta, fused_meta, state = make_params(
        kp, horizon, context_dim, obs_dim, act_dim,
        embt_dim, num_embeddings, hidden_size, ensemble_num)

    inputx = jax.random.normal(kx, (B, horizon, transition_dim), jnp.float32)
    inputts = jnp.tile(jnp.arange(horizon, dtype=jnp.int32)[None, :], (B, 1)) + 3

    (con, loss, obs, act, transiss, enc_x), new_state = traj_encoder_spike_forward(
        params, enc_meta, fused_meta, state, inputx, inputts,
        horizon=horizon, obs_dim=obs_dim, T=T,
        conp=True, obsp=True, actp=True, transip=True)

    jax.block_until_ready((con, loss, obs, act, transiss, enc_x))
    assert con.shape == (B, context_dim)
    assert enc_x.shape == (B, context_dim)
    assert obs.shape == (B, horizon, obs_dim + 1)
    assert act.shape == (B, horizon - 1, act_dim)
    assert len(transiss) == ensemble_num and transiss[0].shape == (B, horizon, obs_dim + 1)
    assert bool(jnp.isfinite(loss)) and bool(jnp.all(jnp.isfinite(obs)))
    assert bool(jnp.all(jnp.isfinite(con))) and bool(jnp.all(jnp.isfinite(act)))
    print("KERNEL_OK")
</pallas_src>

<mosaic_0001>
module attributes {stable_mosaic.version = 11 : i64} {
  func.func @enc_vq_kernel(%arg0: i32, %arg1: memref<8x32xf32, #tpu.memory_space<vmem>>, %arg2: memref<448x128xf32, #tpu.memory_space<vmem>>, %arg3: memref<136x256xf32, #tpu.memory_space<vmem>>, %arg4: memref<8x128xf32, #tpu.memory_space<vmem>>, %arg5: memref<8x128xi32, #tpu.memory_space<vmem>>) attributes {dimension_semantics = [#tpu.dimension_semantics<parallel>], iteration_bounds = array<i64: 1>, scalar_prefetch = 0 : i64, scratch_operands = 0 : i64, tpu.core_type = #tpu.core_type<tc>, window_params = [{transform_indices = @transform_0, window_bounds = array<i64: 8, 32>}, {pipeline_mode = #tpu.pipeline_mode<synchronous>, transform_indices = @transform_1, window_bounds = array<i64: 448, 128>}, {pipeline_mode = #tpu.pipeline_mode<synchronous>, transform_indices = @transform_2, window_bounds = array<i64: 136, 256>}, {transform_indices = @transform_3, window_bounds = array<i64: 8, 128>}, {transform_indices = @transform_4, window_bounds = array<i64: 8, 128>}]} {
    %c0 = arith.constant 0 : index
    %c0_0 = arith.constant 0 : index
    %0 = vector.load %arg1[%c0, %c0_0] : memref<8x32xf32, #tpu.memory_space<vmem>>, vector<8x32xf32>
    %c0_1 = arith.constant 0 : index
    %c0_2 = arith.constant 0 : index
    %1 = vector.load %arg2[%c0_1, %c0_2] : memref<448x128xf32, #tpu.memory_space<vmem>>, vector<32x128xf32>
    %c32 = arith.constant 32 : index
    %c0_3 = arith.constant 0 : index
    %2 = vector.load %arg2[%c32, %c0_3] : memref<448x128xf32, #tpu.memory_space<vmem>>, vector<1x128xf32>
    %c40 = arith.constant 40 : index
    %c0_4 = arith.constant 0 : index
    %3 = vector.load %arg2[%c40, %c0_4] : memref<448x128xf32, #tpu.memory_space<vmem>>, vector<128x128xf32>
    %c168 = arith.constant 168 : index
    %c0_5 = arith.constant 0 : index
    %4 = vector.load %arg2[%c168, %c0_5] : memref<448x128xf32, #tpu.memory_space<vmem>>, vector<1x128xf32>
    %c176 = arith.constant 176 : index
    %c0_6 = arith.constant 0 : index
    %5 = vector.load %arg2[%c176, %c0_6] : memref<448x128xf32, #tpu.memory_space<vmem>>, vector<128x128xf32>
    %c304 = arith.constant 304 : index
    %c0_7 = arith.constant 0 : index
    %6 = vector.load %arg2[%c304, %c0_7] : memref<448x128xf32, #tpu.memory_space<vmem>>, vector<1x128xf32>
    %c312 = arith.constant 312 : index
    %c0_8 = arith.constant 0 : index
    %7 = vector.load %arg2[%c312, %c0_8] : memref<448x128xf32, #tpu.memory_space<vmem>>, vector<128x128xf32>
    %c440 = arith.constant 440 : index
    %c0_9 = arith.constant 0 : index
    %8 = vector.load %arg2[%c440, %c0_9] : memref<448x128xf32, #tpu.memory_space<vmem>>, vector<1x128xf32>
    %cst = arith.constant dense<0.000000e+00> : vector<8x128xf32>
    %9 = tpu.matmul %0, %1, %cst {dimension_numbers = #tpu.dot_dimension_numbers<[1], [0], [0], [1], [0, 0, 1, 1], [], []>} : vector<8x32xf32>, vector<32x128xf32>, vector<8x128xf32> -> vector<8x128xf32>
    %10 = vector.broadcast %2 : vector<1x128xf32> to vector<8x128xf32>
    %11 = arith.addf %9, %10 : vector<8x128xf32>
    %cst_10 = arith.constant 0.000000e+00 : f32
    %12 = vector.broadcast %cst_10 : f32 to vector<8x128xf32>
    %13 = arith.subf %11, %12 : vector<8x128xf32>
    %cst_11 = arith.constant 5.000000e-01 : f32
    %14 = vector.broadcast %cst_11 : f32 to vector<8x128xf32>
    %15 = arith.mulf %13, %14 : vector<8x128xf32>
    %16 = arith.addf %12, %15 : vector<8x128xf32>
    %cst_12 = arith.constant 1.000000e+00 : f32
    %17 = vector.broadcast %cst_12 : f32 to vector<8x128xf32>
    %18 = arith.cmpf oge, %16, %17 : vector<8x128xf32>
    %19 = arith.extui %18 : vector<8x128xi1> to vector<8x128xi32>
    %20 = arith.sitofp %19 : vector<8x128xi32> to vector<8x128xf32>
    %cst_13 = arith.constant 1.000000e+00 : f32
    %21 = vector.broadcast %cst_13 : f32 to vector<8x128xf32>
    %22 = arith.subf %21, %20 : vector<8x128xf32>
    %23 = arith.mulf %16, %22 : vector<8x128xf32>
    %24 = arith.subf %11, %23 : vector<8x128xf32>
    %cst_14 = arith.constant 5.000000e-01 : f32
    %25 = vector.broadcast %cst_14 : f32 to vector<8x128xf32>
    %26 = arith.mulf %24, %25 : vector<8x128xf32>
    %27 = arith.addf %23, %26 : vector<8x128xf32>
    %cst_15 = arith.constant 1.000000e+00 : f32
    %28 = vector.broadcast %cst_15 : f32 to vector<8x128xf32>
    %29 = arith.cmpf oge, %27, %28 : vector<8x128xf32>
    %30 = arith.extui %29 : vector<8x128xi1> to vector<8x128xi32>
    %31 = arith.sitofp %30 : vector<8x128xi32> to vector<8x128xf32>
    %cst_16 = arith.constant 1.000000e+00 : f32
    %32 = vector.broadcast %cst_16 : f32 to vector<8x128xf32>
    %33 = arith.subf %32, %31 : vector<8x128xf32>
    %34 = arith.mulf %27, %33 : vector<8x128xf32>
    %35 = arith.subf %11, %34 : vector<8x128xf32>
    %cst_17 = arith.constant 5.000000e-01 : f32
    %36 = vector.broadcast %cst_17 : f32 to vector<8x128xf32>
    %37 = arith.mulf %35, %36 : vector<8x128xf32>
    %38 = arith.addf %34, %37 : vector<8x128xf32>
    %cst_18 = arith.constant 1.000000e+00 : f32
    %39 = vector.broadcast %cst_18 : f32 to vector<8x128xf32>
    %40 = arith.cmpf oge, %38, %39 : vector<8x128xf32>
    %41 = arith.extui %40 : vector<8x128xi1> to vector<8x128xi32>
    %42 = arith.sitofp %41 : vector<8x128xi32> to vector<8x128xf32>
    %cst_19 = arith.constant 1.000000e+00 : f32
    %43 = vector.broadcast %cst_19 : f32 to vector<8x128xf32>
    %44 = arith.subf %43, %42 : vector<8x128xf32>
    %45 = arith.mulf %38, %44 : vector<8x128xf32>
    %46 = arith.subf %11, %45 : vector<8x128xf32>
    %cst_20 = arith.constant 5.000000e-01 : f32
    %47 = vector.broadcast %cst_20 : f32 to vector<8x128xf32>
    %48 = arith.mulf %46, %47 : vector<8x128xf32>
    %49 = arith.addf %45, %48 : vector<8x128xf32>
    %cst_21 = arith.constant 1.000000e+00 : f32
    %50 = vector.broadcast %cst_21 : f32 to vector<8x128xf32>
    %51 = arith.cmpf oge, %49, %50 : vector<8x128xf32>
    %52 = arith.extui %51 : vector<8x128xi1> to vector<8x128xi32>
    %53 = arith.sitofp %52 : vector<8x128xi32> to vector<8x128xf32>
    %54 = vector.shape_cast %20 : vector<8x128xf32> to vector<1x8x128xf32>
    %55 = vector.shape_cast %31 : vector<8x128xf32> to vector<1x8x128xf32>
    %56 = vector.shape_cast %42 : vector<8x128xf32> to vector<1x8x128xf32>
    %57 = vector.shape_cast %53 : vector<8x128xf32> to vector<1x8x128xf32>
    %58 = tpu.concatenate %54, %55, %56, %57 in 0 : vector<1x8x128xf32>, vector<1x8x128xf32>, vector<1x8x128xf32>, vector<1x8x128xf32> -> vector<4x8x128xf32>
    %59 = vector.shape_cast %58 : vector<4x8x128xf32> to vector<32x128xf32>
    %cst_22 = arith.constant dense<0.000000e+00> : vector<32x128xf32>
    %60 = tpu.matmul %59, %3, %cst_22 {dimension_numbers = #tpu.dot_dimension_numbers<[1], [0], [0], [1], [0, 0, 1, 1], [], []>} : vector<32x128xf32>, vector<128x128xf32>, vector<32x128xf32> -> vector<32x128xf32>
    %61 = vector.broadcast %4 : vector<1x128xf32> to vector<32x128xf32>
    %62 = arith.addf %60, %61 : vector<32x128xf32>
    %63 = vector.shape_cast %62 : vector<32x128xf32> to vector<4x8x128xf32>
    %64 = vector.extract_strided_slice %63 {offsets = [0, 0, 0], sizes = [1, 8, 128], strides = [1, 1, 1]} : vector<4x8x128xf32> to vector<1x8x128xf32>
    %65 = vector.shape_cast %64 : vector<1x8x128xf32> to vector<8x128xf32>
    %66 = vector.extract_strided_slice %63 {offsets = [1, 0, 0], sizes = [1, 8, 128], strides = [1, 1, 1]} : vector<4x8x128xf32> to vector<1x8x128xf32>
    %67 = vector.shape_cast %66 : vector<1x8x128xf32> to vector<8x128xf32>
    %68 = vector.extract_strided_slice %63 {offsets = [2, 0, 0], sizes = [1, 8, 128], strides = [1, 1, 1]} : vector<4x8x128xf32> to vector<1x8x128xf32>
    %69 = vector.shape_cast %68 : vector<1x8x128xf32> to vector<8x128xf32>
    %70 = vector.extract_strided_slice %63 {offsets = [3, 0, 0], sizes = [1, 8, 128], strides = [1, 1, 1]} : vector<4x8x128xf32> to vector<1x8x128xf32>
    %71 = vector.shape_cast %70 : vector<1x8x128xf32> to vector<8x128xf32>
    %cst_23 = arith.constant 0.000000e+00 : f32
    %72 = vector.broadcast %cst_23 : f32 to vector<8x128xf32>
    %73 = arith.subf %65, %72 : vector<8x128xf32>
    %cst_24 = arith.constant 5.000000e-01 : f32
    %74 = vector.broadcast %cst_24 : f32 to vector<8x128xf32>
    %75 = arith.mulf %73, %74 : vector<8x128xf32>
    %76 = arith.addf %72, %75 : vector<8x128xf32>
    %cst_25 = arith.constant 1.000000e+00 : f32
    %77 = vector.broadcast %cst_25 : f32 to vector<8x128xf32>
    %78 = arith.cmpf oge, %76, %77 : vector<8x128xf32>
    %79 = arith.extui %78 : vector<8x128xi1> to vector<8x128xi32>
    %80 = arith.sitofp %79 : vector<8x128xi32> to vector<8x128xf32>
    %cst_26 = arith.constant 1.000000e+00 : f32
    %81 = vector.broadcast %cst_26 : f32 to vector<8x128xf32>
    %82 = arith.subf %81, %80 : vector<8x128xf32>
    %83 = arith.mulf %76, %82 : vector<8x128xf32>
    %84 = arith.subf %67, %83 : vector<8x128xf32>
    %cst_27 = arith.constant 5.000000e-01 : f32
    %85 = vector.broadcast %cst_27 : f32 to vector<8x128xf32>
    %86 = arith.mulf %84, %85 : vector<8x128xf32>
    %87 = arith.addf %83, %86 : vector<8x128xf32>
    %cst_28 = arith.constant 1.000000e+00 : f32
    %88 = vector.broadcast %cst_28 : f32 to vector<8x128xf32>
    %89 = arith.cmpf oge, %87, %88 : vector<8x128xf32>
    %90 = arith.extui %89 : vector<8x128xi1> to vector<8x128xi32>
    %91 = arith.sitofp %90 : vector<8x128xi32> to vector<8x128xf32>
    %cst_29 = arith.constant 1.000000e+00 : f32
    %92 = vector.broadcast %cst_29 : f32 to vector<8x128xf32>
    %93 = arith.subf %92, %91 : vector<8x128xf32>
    %94 = arith.mulf %87, %93 : vector<8x128xf32>
    %95 = arith.subf %69, %94 : vector<8x128xf32>
    %cst_30 = arith.constant 5.000000e-01 : f32
    %96 = vector.broadcast %cst_30 : f32 to vector<8x128xf32>
    %97 = arith.mulf %95, %96 : vector<8x128xf32>
    %98 = arith.addf %94, %97 : vector<8x128xf32>
    %cst_31 = arith.constant 1.000000e+00 : f32
    %99 = vector.broadcast %cst_31 : f32 to vector<8x128xf32>
    %100 = arith.cmpf oge, %98, %99 : vector<8x128xf32>
    %101 = arith.extui %100 : vector<8x128xi1> to vector<8x128xi32>
    %102 = arith.sitofp %101 : vector<8x128xi32> to vector<8x128xf32>
    %cst_32 = arith.constant 1.000000e+00 : f32
    %103 = vector.broadcast %cst_32 : f32 to vector<8x128xf32>
    %104 = arith.subf %103, %102 : vector<8x128xf32>
    %105 = arith.mulf %98, %104 : vector<8x128xf32>
    %106 = arith.subf %71, %105 : vector<8x128xf32>
    %cst_33 = arith.constant 5.000000e-01 : f32
    %107 = vector.broadcast %cst_33 : f32 to vector<8x128xf32>
    %108 = arith.mulf %106, %107 : vector<8x128xf32>
    %109 = arith.addf %105, %108 : vector<8x128xf32>
    %cst_34 = arith.constant 1.000000e+00 : f32
    %110 = vector.broadcast %cst_34 : f32 to vector<8x128xf32>
    %111 = arith.cmpf oge, %109, %110 : vector<8x128xf32>
    %112 = arith.extui %111 : vector<8x128xi1> to vector<8x128xi32>
    %113 = arith.sitofp %112 : vector<8x128xi32> to vector<8x128xf32>
    %114 = vector.shape_cast %80 : vector<8x128xf32> to vector<1x8x128xf32>
    %115 = vector.shape_cast %91 : vector<8x128xf32> to vector<1x8x128xf32>
    %116 = vector.shape_cast %102 : vector<8x128xf32> to vector<1x8x128xf32>
    %117 = vector.shape_cast %113 : vector<8x128xf32> to vector<1x8x128xf32>
    %118 = tpu.concatenate %114, %115, %116, %117 in 0 : vector<1x8x128xf32>, vector<1x8x128xf32>, vector<1x8x128xf32>, vector<1x8x128xf32> -> vector<4x8x128xf32>
    %119 = vector.shape_cast %118 : vector<4x8x128xf32> to vector<32x128xf32>
    %cst_35 = arith.constant dense<0.000000e+00> : vector<32x128xf32>
    %120 = tpu.matmul %119, %5, %cst_35 {dimension_numbers = #tpu.dot_dimension_numbers<[1], [0], [0], [1], [0, 0, 1, 1], [], []>} : vector<32x128xf32>, vector<128x128xf32>, vector<32x128xf32> -> vector<32x128xf32>
    %121 = vector.broadcast %6 : vector<1x128xf32> to vector<32x128xf32>
    %122 = arith.addf %120, %121 : vector<32x128xf32>
    %123 = vector.shape_cast %122 : vector<32x128xf32> to vector<4x8x128xf32>
    %124 = vector.extract_strided_slice %123 {offsets = [0, 0, 0], sizes = [1, 8, 128], strides = [1, 1, 1]} : vector<4x8x128xf32> to vector<1x8x128xf32>
    %125 = vector.shape_cast %124 : vector<1x8x128xf32> to vector<8x128xf32>
    %126 = vector.extract_strided_slice %123 {offsets = [1, 0, 0], sizes = [1, 8, 128], strides = [1, 1, 1]} : vector<4x8x128xf32> to vector<1x8x128xf32>
    %127 = vector.shape_cast %126 : vector<1x8x128xf32> to vector<8x128xf32>
    %128 = vector.extract_strided_slice %123 {offsets = [2, 0, 0], sizes = [1, 8, 128], strides = [1, 1, 1]} : vector<4x8x128xf32> to vector<1x8x128xf32>
    %129 = vector.shape_cast %128 : vector<1x8x128xf32> to vector<8x128xf32>
    %130 = vector.extract_strided_slice %123 {offsets = [3, 0, 0], sizes = [1, 8, 128], strides = [1, 1, 1]} : vector<4x8x128xf32> to vector<1x8x128xf32>
    %131 = vector.shape_cast %130 : vector<1x8x128xf32> to vector<8x128xf32>
    %cst_36 = arith.constant 0.000000e+00 : f32
    %132 = vector.broadcast %cst_36 : f32 to vector<8x128xf32>
    %133 = arith.subf %125, %132 : vector<8x128xf32>
    %cst_37 = arith.constant 5.000000e-01 : f32
    %134 = vector.broadcast %cst_37 : f32 to vector<8x128xf32>
    %135 = arith.mulf %133, %134 : vector<8x128xf32>
    %136 = arith.addf %132, %135 : vector<8x128xf32>
    %cst_38 = arith.constant 1.000000e+00 : f32
    %137 = vector.broadcast %cst_38 : f32 to vector<8x128xf32>
    %138 = arith.cmpf oge, %136, %137 : vector<8x128xf32>
    %139 = arith.extui %138 : vector<8x128xi1> to vector<8x128xi32>
    %140 = arith.sitofp %139 : vector<8x128xi32> to vector<8x128xf32>
    %cst_39 = arith.constant 1.000000e+00 : f32
    %141 = vector.broadcast %cst_39 : f32 to vector<8x128xf32>
    %142 = arith.subf %141, %140 : vector<8x128xf32>
    %143 = arith.mulf %136, %142 : vector<8x128xf32>
    %144 = arith.subf %127, %143 : vector<8x128xf32>
    %cst_40 = arith.constant 5.000000e-01 : f32
    %145 = vector.broadcast %cst_40 : f32 to vector<8x128xf32>
    %146 = arith.mulf %144, %145 : vector<8x128xf32>
    %147 = arith.addf %143, %146 : vector<8x128xf32>
    %cst_41 = arith.constant 1.000000e+00 : f32
    %148 = vector.broadcast %cst_41 : f32 to vector<8x128xf32>
    %149 = arith.cmpf oge, %147, %148 : vector<8x128xf32>
    %150 = arith.extui %149 : vector<8x128xi1> to vector<8x128xi32>
    %151 = arith.sitofp %150 : vector<8x128xi32> to vector<8x128xf32>
    %cst_42 = arith.constant 1.000000e+00 : f32
    %152 = vector.broadcast %cst_42 : f32 to vector<8x128xf32>
    %153 = arith.subf %152, %151 : vector<8x128xf32>
    %154 = arith.mulf %147, %153 : vector<8x128xf32>
    %155 = arith.subf %129, %154 : vector<8x128xf32>
    %cst_43 = arith.constant 5.000000e-01 : f32
    %156 = vector.broadcast %cst_43 : f32 to vector<8x128xf32>
    %157 = arith.mulf %155, %156 : vector<8x128xf32>
    %158 = arith.addf %154, %157 : vector<8x128xf32>
    %cst_44 = arith.constant 1.000000e+00 : f32
    %159 = vector.broadcast %cst_44 : f32 to vector<8x128xf32>
    %160 = arith.cmpf oge, %158, %159 : vector<8x128xf32>
    %161 = arith.extui %160 : vector<8x128xi1> to vector<8x128xi32>
    %162 = arith.sitofp %161 : vector<8x128xi32> to vector<8x128xf32>
    %cst_45 = arith.constant 1.000000e+00 : f32
    %163 = vector.broadcast %cst_45 : f32 to vector<8x128xf32>
    %164 = arith.subf %163, %162 : vector<8x128xf32>
    %165 = arith.mulf %158, %164 : vector<8x128xf32>
    %166 = arith.subf %131, %165 : vector<8x128xf32>
    %cst_46 = arith.constant 5.000000e-01 : f32
    %167 = vector.broadcast %cst_46 : f32 to vector<8x128xf32>
    %168 = arith.mulf %166, %167 : vector<8x128xf32>
    %169 = arith.addf %165, %168 : vector<8x128xf32>
    %cst_47 = arith.constant 1.000000e+00 : f32
    %170 = vector.broadcast %cst_47 : f32 to vector<8x128xf32>
    %171 = arith.cmpf oge, %169, %170 : vector<8x128xf32>
    %172 = arith.extui %171 : vector<8x128xi1> to vector<8x128xi32>
    %173 = arith.sitofp %172 : vector<8x128xi32> to vector<8x128xf32>
    %174 = vector.shape_cast %140 : vector<8x128xf32> to vector<1x8x128xf32>
    %175 = vector.shape_cast %151 : vector<8x128xf32> to vector<1x8x128xf32>
    %176 = vector.shape_cast %162 : vector<8x128xf32> to vector<1x8x128xf32>
    %177 = vector.shape_cast %173 : vector<8x128xf32> to vector<1x8x128xf32>
    %178 = tpu.concatenate %174, %175, %176, %177 in 0 : vector<1x8x128xf32>, vector<1x8x128xf32>, vector<1x8x128xf32>, vector<1x8x128xf32> -> vector<4x8x128xf32>
    %179 = vector.shape_cast %178 : vector<4x8x128xf32> to vector<32x128xf32>
    %cst_48 = arith.constant dense<0.000000e+00> : vector<32x128xf32>
    %180 = tpu.matmul %179, %7, %cst_48 {dimension_numbers = #tpu.dot_dimension_numbers<[1], [0], [0], [1], [0, 0, 1, 1], [], []>} : vector<32x128xf32>, vector<128x128xf32>, vector<32x128xf32> -> vector<32x128xf32>
    %181 = vector.broadcast %8 : vector<1x128xf32> to vector<32x128xf32>
    %182 = arith.addf %180, %181 : vector<32x128xf32>
    %183 = vector.shape_cast %182 : vector<32x128xf32> to vector<4x8x128xf32>
    %cst_49 = arith.constant dense<0.000000e+00> : vector<8x128xf32>
    %184 = vector.multi_reduction <add>, %183, %cst_49 [0] : vector<4x8x128xf32> to vector<8x128xf32>
    %cst_50 = arith.constant 2.500000e-01 : f32
    %185 = vector.broadcast %cst_50 : f32 to vector<8x128xf32>
    %186 = arith.mulf %184, %185 : vector<8x128xf32>
    %c0_51 = arith.constant 0 : index
    %c0_52 = arith.constant 0 : index
    %187 = vector.load %arg4[%c0_51, %c0_52] : memref<8x128xf32, #tpu.memory_space<vmem>>, vector<8x128xf32>
    tpu.vector_store %arg4[%c0_51, %c0_52], %186 {strides = array<i32>} : memref<8x128xf32, #tpu.memory_space<vmem>>, vector<8x128xf32>,
    %c0_53 = arith.constant 0 : index
    %c0_54 = arith.constant 0 : index
    %188 = vector.load %arg3[%c0_53, %c0_54] : memref<136x256xf32, #tpu.memory_space<vmem>>, vector<128x256xf32>
    %c128 = arith.constant 128 : index
    %c0_55 = arith.constant 0 : index
    %189 = vector.load %arg3[%c128, %c0_55] : memref<136x256xf32, #tpu.memory_space<vmem>>, vector<1x256xf32>
    %190 = arith.mulf %186, %186 : vector<8x128xf32>
    %cst_56 = arith.constant dense<0.000000e+00> : vector<8xf32>
    %191 = vector.multi_reduction <add>, %190, %cst_56 [1] : vector<8x128xf32> to vector<8xf32>
    %192 = vector.shape_cast %191 : vector<8xf32> to vector<8x1xf32>
    %193 = vector.broadcast %192 : vector<8x1xf32> to vector<8x256xf32>
    %194 = vector.broadcast %189 : vector<1x256xf32> to vector<8x256xf32>
    %195 = arith.addf %193, %194 : vector<8x256xf32>
    %cst_57 = arith.constant dense<0.000000e+00> : vector<8x256xf32>
    %196 = tpu.matmul %186, %188, %cst_57 {dimension_numbers = #tpu.dot_dimension_numbers<[1], [0], [0], [1], [0, 0, 1, 1], [], []>} : vector<8x128xf32>, vector<128x256xf32>, vector<8x256xf32> -> vector<8x256xf32>
    %cst_58 = arith.constant 2.000000e+00 : f32
    %197 = vector.broadcast %cst_58 : f32 to vector<8x256xf32>
    %198 = arith.mulf %197, %196 : vector<8x256xf32>
    %199 = arith.subf %195, %198 : vector<8x256xf32>
    %cst_59 = arith.constant dense<0x7F800000> : vector<8xf32>
    %200 = vector.multi_reduction <minimumf>, %199, %cst_59 [1] : vector<8x256xf32> to vector<8xf32>
    %201 = vector.shape_cast %200 : vector<8xf32> to vector<8x1xf32>
    %202 = tpu.iota {dimensions = array<i32: 1>} : vector<8x256xi32>
    %203 = vector.broadcast %201 : vector<8x1xf32> to vector<8x256xf32>
    %204 = arith.cmpf ole, %199, %203 : vector<8x256xf32>
    %c2147483647_i32 = arith.constant 2147483647 : i32
    %205 = vector.broadcast %c2147483647_i32 : i32 to vector<8x256xi32>
    %206 = arith.select %204, %202, %205 : vector<8x256xi1>, vector<8x256xi32>
    %cst_60 = arith.constant dense<2147483647> : vector<8xi32>
    %207 = vector.multi_reduction <minsi>, %206, %cst_60 [1] : vector<8x256xi32> to vector<8xi32>
    %208 = vector.shape_cast %207 : vector<8xi32> to vector<8x1xi32>
    %209 = vector.shape_cast %208 : vector<8x1xi32> to vector<8x1xi32>
    %210 = vector.broadcast %209 : vector<8x1xi32> to vector<8x128xi32>
    %c0_61 = arith.constant 0 : index
    %c0_62 = arith.constant 0 : index
    %211 = vector.load %arg5[%c0_61, %c0_62] : memref<8x128xi32, #tpu.memory_space<vmem>>, vector<8x128xi32>
    tpu.vector_store %arg5[%c0_61, %c0_62], %210 {strides = array<i32>} : memref<8x128xi32, #tpu.memory_space<vmem>>, vector<8x128xi32>,
    return
  }
  func.func @transform_0(%arg0: i32) -> (i32, i32) {
    %c0_i32 = arith.constant 0 : i32
    %c0_i32_0 = arith.constant 0 : i32
    return %arg0, %c0_i32 : i32, i32
  }
  func.func @transform_1(%arg0: i32) -> (i32, i32) {
    %c0_i32 = arith.constant 0 : i32
    %c0_i32_0 = arith.constant 0 : i32
    %c0_i32_1 = arith.constant 0 : i32
    return %c0_i32, %c0_i32_0 : i32, i32
  }
  func.func @transform_2(%arg0: i32) -> (i32, i32) {
    %c0_i32 = arith.constant 0 : i32
    %c0_i32_0 = arith.constant 0 : i32
    %c0_i32_1 = arith.constant 0 : i32
    return %c0_i32, %c0_i32_0 : i32, i32
  }
  func.func @transform_3(%arg0: i32) -> (i32, i32) {
    %c0_i32 = arith.constant 0 : i32
    %c0_i32_0 = arith.constant 0 : i32
    return %arg0, %c0_i32 : i32, i32
  }
  func.func @transform_4(%arg0: i32) -> (i32, i32) {
    %c0_i32 = arith.constant 0 : i32
    %c0_i32_0 = arith.constant 0 : i32
    return %arg0, %c0_i32 : i32, i32
  }
}

</mosaic_0001>

<bundles_post_ra>
// kernel: tpu_custom_call.1
= control target key start
LH: loop header
LB: loop body
LE: loop exit
PB: predicated region body
PF: predicated region fallthrough
CT: control target
= control target key end

     0   :  { %10 = vsyncpa [#allocation3], 0  ;;  %s1338_s0 = inlined_call_operand.hbm [shape: f32[8,32], index: 0, kind: input, shape index: {}]   ;;  %s1339_s1 = inlined_call_operand.hbm [shape: f32[448,128], index: 1, kind: input, shape index: {}]   ;;  %s1340_s2 = inlined_call_operand.hbm [shape: f32[136,256], index: 2, kind: input, shape index: {}]   ;;  %s1341_s3 = inlined_call_operand.hbm [shape: f32[8,128], index: 3, kind: output, shape index: {0}]   ;;  %s1342_s4 = inlined_call_operand.hbm [shape: s32[8,128], index: 4, kind: output, shape index: {1}]  }
   0x1   :  { %11 = vsyncpa [#allocation6], 0 }
   0x2   :  { %12 = vsyncpa [#allocation4], 0 }
   0x3   :  { %13 = vsyncpa [#allocation10], 0  ;;  %s1217_s15 = smov [#allocation5]   ;;  %s1099_s19 = scalar_lea.hbm %s1339_s1, 7168 }
   0x4   :  { %s29_s16 = sshll.u32 %s1217_s15, 4  ;;  %p1100_p0 = scmp.ne.s32.totalorder %s1339_s1, %s1099_s19  ;;  %s30_s16 = int_to_ptr.vmem [resolvable:$true] %s29_s16 }
   0x5   :  { %p1103_p1 = scmp.lt.u32.totalorder %s1099_s19, %s1339_s1 }
   0x7   :  { %p1105_p2 = pnand %p1103_p1, %p1100_p0 }
   0x9   :  { %1108 = shalt.err (!%p1105_p2)
}
   0xa   :  { %s1109_s24 = scalar_lea.vmem %s30_s16, 7168  ;;  %p1114_p4 = scmp.lt.s32.totalorder %s30_s16, %s30_s16 }
   0xb   :  { %p1110_p3 = scmp.ne.s32.totalorder %s30_s16, %s1109_s24  ;;  %p1115_p5 = scmp.lt.s32.totalorder %s1109_s24, %s1109_s24 }
   0xd   :  { %p1116_p6 = por %p1115_p5, %p1114_p4 }
   0xf   :  { %p1117_p7 = pnand %p1116_p6, %p1110_p3 }
  0x11   :  { %1120 = shalt.err (!%p1117_p7)
}
  0x12   :  { %s1218_s25 = smov 128   ;;  %s1219_s26 = smov 8  }
  0x13   :  { %35 = dma.hbm_to_vmem [thread:$0]  %s1339_s1, 7168, %s30_s16, [#allocation6], %s1218_s25, %s1218_s25, %s1219_s26  }
  0x14   :  { %s1220_s29 = smov [#allocation2]   ;;  %s1221_s5 = smov [#allocation7]  }
  0x15   :  { %s20_s30 = sshll.u32 %s1220_s29, 4  ;;  %s41_s6 = sshll.u32 %s1221_s5, 4  ;;  %s21_s30 = int_to_ptr.vmem [resolvable:$true] %s20_s30  ;;  %s42_s6 = int_to_ptr.vmem [resolvable:$true] %s41_s6 }
  0x16   :  { %s1121_s9 = scalar_lea.hbm %s1338_s0, 128 }
  0x17   :  { %p1122_p8 = scmp.ne.s32.totalorder %s1338_s0, %s1121_s9  ;;  %p1125_p9 = scmp.lt.u32.totalorder %s1121_s9, %s1338_s0 }
  0x19   :  { %p1127_p10 = pnand %p1125_p9, %p1122_p8 }
  0x1b   :  { %1130 = shalt.err (!%p1127_p10)
}
  0x1c   :  { %s1131_s1 = scalar_lea.vmem %s21_s30, 128  ;;  %p1136_p12 = scmp.lt.s32.totalorder %s21_s30, %s21_s30 }
  0x1d   :  { %p1132_p11 = scmp.ne.s32.totalorder %s21_s30, %s1131_s1  ;;  %p1137_p13 = scmp.lt.s32.totalorder %s1131_s1, %s1131_s1 }
  0x1f   :  { %p1138_p0 = por %p1137_p13, %p1136_p12 }
  0x21   :  { %p1139_p1 = pnand %p1138_p0, %p1132_p11 }
  0x23   :  { %1142 = shalt.err (!%p1139_p1)
}
  0x24   :  { %23 = dma.hbm_to_vmem [thread:$0]  %s1338_s0, 128, %s21_s30, [#allocation3]  }
  0x25   :  { %s1143_s18 = scalar_lea.hbm %s1340_s2, 4352 }
  0x26   :  { %p1144_p2 = scmp.ne.s32.totalorder %s1340_s2, %s1143_s18  ;;  %p1147_p3 = scmp.lt.u32.totalorder %s1143_s18, %s1340_s2 }
  0x28   :  { %p1149_p4 = pnand %p1147_p3, %p1144_p2 }
  0x2a   :  { %1152 = shalt.err (!%p1149_p4)
}
  0x2b   :  { %s1153_s23 = scalar_lea.vmem %s42_s6, 4352  ;;  %p1158_p6 = scmp.lt.s32.totalorder %s42_s6, %s42_s6 }
  0x2c   :  { %p1154_p5 = scmp.ne.s32.totalorder %s42_s6, %s1153_s23  ;;  %p1159_p7 = scmp.lt.s32.totalorder %s1153_s23, %s1153_s23 }
  0x2e   :  { %p1160_p8 = por %p1159_p7, %p1158_p6 }
  0x30   :  { %p1161_p9 = pnand %p1160_p8, %p1154_p5 }
  0x32   :  { %1164 = shalt.err (!%p1161_p9)
}
  0x33   :  { %s1222_s0 = smov 256   ;;  %s1223_s24 = smov 16  }
  0x34   :  { %47 = dma.hbm_to_vmem [thread:$0]  %s1340_s2, 4352, %s42_s6, [#allocation6], %s1222_s0, %s1222_s0, %s1223_s24  }
  0x35   :  { %1209 = dma.done.wait [#allocation3], 128  }
  0x36   :  { %1210 = vsyncadd [#allocation3], 4294967168 }
  0x37   :  { %1211 = dma.done.wait [#allocation6], 11520  }
  0x38   :  { %1212 = vsyncadd [#allocation6], 4294955776  ;;  %v1224_v0 = vmov 0.0|0.0   ;;  %vm1225_vm0 = vmmov 0   ;;  %v1226_v1 = vmov 0.0   ;;  %v58_v2 = vld [vmem:[#allocation5] sm:$0xff] }
  0x39   :  { %952 = vmatprep.subr.bf16.mxu0 %v1224_v0  ;;  %835 = vmatprep.mubr.msk.f32.mxu0 %vm1225_vm0, %v1226_v1  ;;  %v59_v3 = vld [vmem:[#allocation5 + $0x8] sm:$0xff]  ;;  %v60_v4 = vld [vmem:[#allocation5 + $0x10] sm:$0xff]  ;;  %v61_v6 = vld [vmem:[#allocation5 + $0x18] sm:$0xff]  ;;  %vm118_vm1 = vcmask 261120   ;;  %v1227_v51 = vmov 1.0   ;;  %s1228_s2 = smov [#allocation8]  }
  0x3a   :  { %v953_v5 = vpack.c.bf16 %v59_v3, %v58_v2  ;;  %v63_v7 = vld [vmem:[#allocation5 + $0x28] sm:$0xff]  ;;  %v64_v8 = vld [vmem:[#allocation5 + $0x30] sm:$0xff]  ;;  %v65_v9 = vld [vmem:[#allocation5 + $0x38] sm:$0xff]  ;;  %v956_v11 = vpack.c.bf16 %v61_v6, %v60_v4  ;;  %s709_s27 = sshll.u32 %s1228_s2, 4  ;;  %s710_s27 = int_to_ptr.vmem [resolvable:$true] %s709_s27 }
  0x3b   :  { %v66_v10 = vld [vmem:[#allocation5 + $0x40] sm:$0xff]  ;;  %v958_v12 = vpack.c.bf16 %v64_v8, %v63_v7  ;;  %v67_v14 = vld [vmem:[#allocation5 + $0x48] sm:$0xff]  ;;  %v68_v15 = vld [vmem:[#allocation5 + $0x50] sm:$0xff]  ;;  %s1165_s28 = scalar_lea.vmem %s710_s27, 128  ;;  %p1170_p11 = scmp.lt.s32.totalorder %s710_s27, %s710_s27 }
  0x3c   :  { %954 = vmatpush3.bf16.msra.mxu0 %v953_v5  ;;  %v962_v13 = vpack.c.bf16 %v66_v10, %v65_v9  ;;  %v57_v16 = vld [vmem:[#allocation2] sm:$0xff]  ;;  %v966_v17 = vpack.c.bf16 %v68_v15, %v67_v14  ;;  %v70_v19 = vld [vmem:[#allocation5 + $0x60] sm:$0xff]  ;;  %v71_v21 = vld [vmem:[#allocation5 + $0x68] sm:$0xff]  ;;  %p1166_p10 = scmp.ne.s32.totalorder %s710_s27, %s1165_s28  ;;  %p1171_p12 = scmp.lt.s32.totalorder %s1165_s28, %s1165_s28 }
  0x3d   :  { %955 = vmatprep.subr.bf16.mxu0 %v1224_v0  ;;  %959 = vmatprep.subr.bf16.mxu1 %v958_v12  ;;  %v69_v18 = vld [vmem:[#allocation5 + $0x58] sm:$0xff]  ;;  %v72_v22 = vld [vmem:[#allocation5 + $0x70] sm:$0xff]  ;;  %v74_v25 = vld [vmem:[#allocation5 + $0x80] sm:$0xff] }
  0x3e   :  { %961 = vmatpush3.bf16.msra.mxu1 %v958_v12  ;;  %v970_v20 = vpack.c.bf16 %v70_v19, %v69_v18  ;;  %v974_v23 = vpack.c.bf16 %v72_v22, %v71_v21  ;;  %v73_v24 = vld [vmem:[#allocation5 + $0x78] sm:$0xff]  ;;  %v75_v27 = vld [vmem:[#allocation5 + $0x88] sm:$0xff]  ;;  %v76_v28 = vld [vmem:[#allocation5 + $0x90] sm:$0xff]  ;;  %p1172_p13 = por %p1171_p12, %p1170_p11 }
  0x3f   :  { %963 = vmatprep.subr.bf16.mxu1 %v962_v13  ;;  %v978_v26 = vpack.c.bf16 %v74_v25, %v73_v24  ;;  %v982_v29 = vpack.c.bf16 %v76_v28, %v75_v27  ;;  %v77_v30 = vld [vmem:[#allocation5 + $0x98] sm:$0xff]  ;;  %v78_v31 = vld [vmem:[#allocation5 + $0xa0] sm:$0xff]  ;;  %v80_v33 = vld [vmem:[#allocation5 + $0xb0] sm:$0xff] }
  0x40   :  { %957 = vmatpush3.bf16.msra.mxu0 %v956_v11  ;;  %v986_v32 = vpack.c.bf16 %v78_v31, %v77_v30  ;;  %v81_v34 = vld [vmem:[#allocation5 + $0xb8] sm:$0xff]  ;;  %v82_v35 = vld [vmem:[#allocation5 + $0xc0] sm:$0xff]  ;;  %v83_v37 = vld [vmem:[#allocation5 + $0xc8] sm:$0xff]  ;;  %p1173_p0 = pnand %p1172_p13, %p1166_p10 }
  0x41   :  { %v990_v36 = vpack.c.bf16 %v81_v34, %v80_v33  ;;  %v994_v38 = vpack.c.bf16 %v83_v37, %v82_v35  ;;  %v84_v39 = vld [vmem:[#allocation5 + $0xd0] sm:$0xff]  ;;  %v85_v40 = vld [vmem:[#allocation5 + $0xd8] sm:$0xff]  ;;  %v86_v42 = vld [vmem:[#allocation5 + $0xe0] sm:$0xff] }
  0x42   :  { %965 = vmatpush3.bf16.msra.mxu1 %v962_v13  ;;  %v998_v41 = vpack.c.bf16 %v85_v40, %v84_v39  ;;  %v87_v43 = vld [vmem:[#allocation5 + $0xe8] sm:$0xff]  ;;  %v733_v45 = vld [vmem:[#allocation5 + $0x20] ss:$0 sm:$0xff]  ;;  %v88_v6 = vld [vmem:[#allocation5 + $0xf0] sm:$0xff] }
  0x43   :  { %836 = vmatmul.mubr.msk.f32.vlgmr.msra.gmra.mrb[0].mxu0 %vm118_vm1, %v57_v16  ;;  %967 = vmatprep.subr.bf16.mxu1 %v966_v17  ;;  %v1002_v44 = vpack.c.bf16 %v87_v43, %v86_v42  ;;  %v89_v7 = vld [vmem:[#allocation5 + $0xf8] sm:$0xff]  ;;  %v90_v9 = vld [vmem:[#allocation5 + $0x100] sm:$0xff]  ;;  %v91_v10 = vld [vmem:[#allocation5 + $0x108] sm:$0xff] }
  0x44   :  { %991 = vmatprep.subr.bf16.mxu0 %v990_v36  ;;  %v1006_v8 = vpack.c.bf16 %v89_v7, %v88_v6  ;;  %v1010_v11 = vpack.c.bf16 %v91_v10, %v90_v9  ;;  %v92_v12 = vld [vmem:[#allocation5 + $0x110] sm:$0xff]  ;;  %v93_v13 = vld [vmem:[#allocation5 + $0x118] sm:$0xff]  ;;  %v94_v15 = vld [vmem:[#allocation5 + $0x120] sm:$0xff] }
  0x45   :  { %993 = vmatpush3.bf16.msra.mxu0 %v990_v36  ;;  %v1014_v14 = vpack.c.bf16 %v93_v13, %v92_v12  ;;  %v95_v16 = vld [vmem:[#allocation5 + $0x128] sm:$0xff]  ;;  %v97_v18 = vld [vmem:[#allocation5 + $0x138] sm:$0xff]  ;;  %v98_v19 = vld [vmem:[#allocation5 + $0x140] sm:$0xff] }
  0x46   :  { %969 = vmatpush3.bf16.msra.mxu1 %v966_v17  ;;  %995 = vmatprep.subr.bf16.mxu0 %v994_v38  ;;  %v1018_v17 = vpack.c.bf16 %v95_v16, %v94_v15  ;;  %v1022_v21 = vpack.c.bf16 %v98_v19, %v97_v18  ;;  %v100_v22 = vld [vmem:[#allocation5 + $0x150] sm:$0xff]  ;;  %v101_v24 = vld [vmem:[#allocation5 + $0x158] sm:$0xff]  ;;  %v102_v25 = vld [vmem:[#allocation5 + $0x160] sm:$0xff] }
  0x47   :  { %971 = vmatprep.subr.bf16.mxu1 %v970_v20  ;;  %v103_v27 = vld [vmem:[#allocation5 + $0x168] sm:$0xff]  ;;  %v104_v28 = vld [vmem:[#allocation5 + $0x170] sm:$0xff] }
  0x48   :  { %v739_v30 = vld [vmem:[#allocation5 + $0xa8] ss:$0 sm:$0xff]  ;;  %v112_v6 = vld [vmem:[#allocation5 + $0x1b0] sm:$0xff] }
  0x49   :  { %997 = vmatpush3.bf16.msra.mxu0 %v994_v38 }
  0x4a   :  { %973 = vmatpush3.bf16.msra.mxu1 %v970_v20  ;;  %999 = vmatprep.subr.bf16.mxu0 %v998_v41  ;;  %v99_v20 = vld [vmem:[#allocation5 + $0x148] sm:$0xff] }
  0x4b   :  { %975 = vmatprep.subr.bf16.mxu1 %v974_v23 }
  0x4d   :  { %1001 = vmatpush3.bf16.msra.mxu0 %v998_v41 }
  0x4e   :  { %977 = vmatpush3.bf16.msra.mxu1 %v974_v23  ;;  %1003 = vmatprep.subr.bf16.mxu0 %v1002_v44  ;;  %v1026_v23 = vpack.c.bf16 %v100_v22, %v99_v20 }
  0x4f   :  { %979 = vmatprep.subr.bf16.mxu1 %v978_v26 }
  0x51   :  { %1005 = vmatpush3.bf16.msra.mxu0 %v1002_v44 }
  0x52   :  { %981 = vmatpush3.bf16.msra.mxu1 %v978_v26  ;;  %1007 = vmatprep.subr.bf16.mxu0 %v1006_v8  ;;  %v1030_v26 = vpack.c.bf16 %v102_v25, %v101_v24 }
  0x53   :  { %983 = vmatprep.subr.bf16.mxu1 %v982_v29 }
  0x55   :  { %1009 = vmatpush3.bf16.msra.mxu0 %v1006_v8  ;;  %v748_v8 = vld [vmem:[#allocation5 + $0x130] ss:$0 sm:$0xff] }
  0x56   :  { %985 = vmatpush3.bf16.msra.mxu1 %v982_v29  ;;  %1011 = vmatprep.subr.bf16.mxu0 %v1010_v11  ;;  %v1034_v29 = vpack.c.bf16 %v104_v28, %v103_v27 }
  0x57   :  { %987 = vmatprep.subr.bf16.mxu1 %v986_v32 }
  0x59   :  { %1013 = vmatpush3.bf16.msra.mxu0 %v1010_v11 }
  0x5a   :  { %989 = vmatpush3.bf16.msra.mxu1 %v986_v32  ;;  %1015 = vmatprep.subr.bf16.mxu0 %v1014_v14 }
  0x5b   :  { %1023 = vmatprep.subr.bf16.mxu1 %v1022_v21 }
  0x5d   :  { %1017 = vmatpush3.bf16.msra.mxu0 %v1014_v14 }
  0x5e   :  { %1019 = vmatprep.subr.bf16.mxu0 %v1018_v17 }
  0x61   :  { %1021 = vmatpush3.bf16.msra.mxu0 %v1018_v17 }
 0x116   :  { %v188_v46 = vpop.f32.mrb[0].mxu0 }
 0x117   :  { %v189_v47 = vadd.f32 %v733_v45, %v188_v46  ;;  %v837_v48 = vpop.f32.mrb[1].mxu0 }
 0x119   :  { %v192_v49 = vmul.f32 0.5, %v189_v47 }
 0x11b   :  { %vm194_vm2 = vcmp.ge.f32.partialorder %v192_v49, 1.0 }
 0x11c   :  { %v735_v50 = vsel %vm194_vm2, 1.0, %v1226_v1  ;;  %870 = vmatprep.mubr.msk.f32.mxu1 %vm194_vm2, %v1227_v51 }
 0x11d   :  { %v197_v52 = vsub.f32 1.0, %v735_v50 }
 0x11f   :  { %v198_v53 = vmul.f32 %v197_v52, %v192_v49 }
 0x121   :  { %v199_v54 = vsub.f32 %v189_v47, %v198_v53 }
 0x123   :  { %v200_v55 = vmul.f32 0.5, %v199_v54 }
 0x125   :  { %v201_v56 = vadd.f32 %v200_v55, %v198_v53 }
 0x127   :  { %vm202_vm3 = vcmp.ge.f32.partialorder %v201_v56, 1.0 }
 0x128   :  { %v736_v57 = vsel %vm202_vm3, 1.0, %v1226_v1  ;;  %871 = vmatmul.mubr.msk.f32.vlgmr.msra.gmra.mrb[0].mxu1 %vm202_vm3, %v1227_v51 }
 0x129   :  { %v205_v58 = vsub.f32 1.0, %v736_v57  ;;  %1025 = vmatpush3.bf16.msra.mxu1 %v1022_v21 }
 0x12a   :  { %1027 = vmatprep.subr.bf16.mxu1 %v1026_v23 }
 0x12b   :  { %v206_v59 = vmul.f32 %v205_v58, %v201_v56 }
 0x12d   :  { %v207_v60 = vsub.f32 %v189_v47, %v206_v59  ;;  %1029 = vmatpush3.bf16.msra.mxu1 %v1026_v23 }
 0x12e   :  { %1031 = vmatprep.subr.bf16.mxu1 %v1030_v26 }
 0x12f   :  { %v208_v61 = vmul.f32 0.5, %v207_v60  ;;  %v106_v60 = vld [vmem:[#allocation5 + $0x180] sm:$0xff] }
 0x131   :  { %v209_v62 = vadd.f32 %v208_v61, %v206_v59  ;;  %1033 = vmatpush3.bf16.msra.mxu1 %v1030_v26  ;;  %v105_v59 = vld [vmem:[#allocation5 + $0x178] sm:$0xff] }
 0x132   :  { %1035 = vmatprep.subr.bf16.mxu1 %v1034_v29  ;;  %v1038_v61 = vpack.c.bf16 %v106_v60, %v105_v59  ;;  %v570_v59 = vld [vmem:[#allocation7 + $0x98] sm:$0xff] }
 0x133   :  { %vm210_vm4 = vcmp.ge.f32.partialorder %v209_v62, 1.0 }
 0x134   :  { %v737_v63 = vsel %vm210_vm4, 1.0, %v1226_v1  ;;  %873 = vmatprep.mubr.msk.f32.mxu1 %vm210_vm4, %v1227_v51 }
 0x135   :  { %v213_v0 = vsub.f32 1.0, %v737_v63  ;;  %1037 = vmatpush3.bf16.msra.mxu1 %v1034_v29  ;;  %v108_v63 = vld [vmem:[#allocation5 + $0x190] sm:$0xff] }
 0x136   :  { %1039 = vmatprep.subr.bf16.mxu1 %v1038_v61 }
 0x137   :  { %v214_v2 = vmul.f32 %v213_v0, %v209_v62  ;;  %v107_v62 = vld [vmem:[#allocation5 + $0x188] sm:$0xff] }
 0x138   :  { %v1042_v0 = vpack.c.bf16 %v108_v63, %v107_v62  ;;  %v567_v62 = vld [vmem:[#allocation7 + $0x80] sm:$0xff]  ;;  %v569_v63 = vld [vmem:[#allocation7 + $0x90] sm:$0xff] }
 0x139   :  { %v215_v3 = vsub.f32 %v189_v47, %v214_v2  ;;  %1041 = vmatpush3.bf16.msra.mxu1 %v1038_v61 }
 0x13a   :  { %1043 = vmatprep.subr.bf16.mxu1 %v1042_v0 }
 0x13b   :  { %v216_v4 = vmul.f32 0.5, %v215_v3  ;;  %v110_v3 = vld [vmem:[#allocation5 + $0x1a0] sm:$0xff] }
 0x13d   :  { %v217_v5 = vadd.f32 %v216_v4, %v214_v2  ;;  %1045 = vmatpush3.bf16.msra.mxu1 %v1042_v0  ;;  %v109_v2 = vld [vmem:[#allocation5 + $0x198] sm:$0xff]  ;;  %v572_v0 = vld [vmem:[#allocation7 + $0xa8] sm:$0xff] }
 0x13e   :  { %v1046_v4 = vpack.c.bf16 %v110_v3, %v109_v2  ;;  %v574_v2 = vld [vmem:[#allocation7 + $0xb8] sm:$0xff]  ;;  %v1072_v3 = vpack.c.bf16 %v569_v63, %v567_v62 }
 0x13f   :  { %vm218_vm5 = vcmp.ge.f32.partialorder %v217_v5, 1.0  ;;  %v111_v5 = vld [vmem:[#allocation5 + $0x1a8] sm:$0xff] }
 0x140   :  { %874 = vmatmul.mubr.msk.f32.gmra.mrb[2].mxu1 %vm218_vm5, %v1227_v51  ;;  %1047 = vmatprep.subr.bf16.mxu1 %v1046_v4  ;;  %v1050_v7 = vpack.c.bf16 %v112_v6, %v111_v5  ;;  %v571_v5 = vld [vmem:[#allocation7 + $0xa0] sm:$0xff]  ;;  %v573_v6 = vld [vmem:[#allocation7 + $0xb0] sm:$0xff] }
 0x141   :  { %1049 = vmatpush3.bf16.msra.mxu1 %v1046_v4  ;;  %v1074_v4 = vpack.c.bf16 %v574_v2, %v572_v0 }
 0x142   :  { %1051 = vmatprep.subr.bf16.mxu1 %v1050_v7 }
 0x145   :  { %1053 = vmatpush3.bf16.msra.mxu1 %v1050_v7  ;;  %v1076_v7 = vpack.c.bf16 %v573_v6, %v571_v5 }
 0x1fb   :  { %v872_v31 = vpop.f32.mrb[0].mxu1 }
 0x1fc   :  { %v291_v32 = vpop.f32.mrb[1].mxu1  ;;  %v297_v37 = vadd.f32 %v872_v31, %v739_v30 }
 0x1fd   :  { %v292_v33 = vadd.f32 %v739_v30, %v291_v32 }
 0x1ff   :  { %v310_v34 = vmul.f32 0.5, %v292_v33 }
 0x201   :  { %vm312_vm6 = vcmp.ge.f32.partialorder %v310_v34, 1.0 }
 0x202   :  { %v744_v35 = vsel %vm312_vm6, 1.0, %v1226_v1  ;;  %908 = vmatprep.mubr.msk.f32.mxu0 %vm312_vm6, %v1227_v51 }
 0x203   :  { %v315_v36 = vsub.f32 1.0, %v744_v35 }
 0x205   :  { %v316_v38 = vmul.f32 %v315_v36, %v310_v34  ;;  %v552_v36 = vld [vmem:[#allocation7 + $0x8] sm:$0xff] }
 0x207   :  { %v317_v39 = vsub.f32 %v297_v37, %v316_v38  ;;  %v554_v37 = vld [vmem:[#allocation7 + $0x18] sm:$0xff] }
 0x209   :  { %v318_v40 = vmul.f32 0.5, %v317_v39  ;;  %v1054_v39 = vpack.c.bf16 %v554_v37, %v552_v36  ;;  %v584_v37 = vld [vmem:[#allocation7 + $0x100] ss:$8 sm:$0x3] }
 0x20b   :  { %v319_v41 = vadd.f32 %v318_v40, %v316_v38  ;;  %v551_v38 = vld [vmem:[#allocation7] sm:$0xff]  ;;  %v553_v40 = vld [vmem:[#allocation7 + $0x10] sm:$0xff]  ;;  %1055 = vmatprep.subr.bf16.mxu0 %v1054_v39 }
 0x20d   :  { %vm320_vm7 = vcmp.ge.f32.partialorder %v319_v41, 1.0 }
 0x20e   :  { %909 = vmatmul.mubr.msk.f32.vlgmr.msra.gmra.mrb[2].mxu0 %vm320_vm7, %v1227_v51  ;;  %v745_v42 = vsel %vm320_vm7, 1.0, %v1226_v1 }
 0x20f   :  { %v323_v43 = vsub.f32 1.0, %v745_v42  ;;  %v558_v42 = vld [vmem:[#allocation7 + $0x38] sm:$0xff] }
 0x211   :  { %v324_v47 = vmul.f32 %v323_v43, %v319_v41  ;;  %v556_v41 = vld [vmem:[#allocation7 + $0x28] sm:$0xff]  ;;  %v1056_v43 = vpack.c.bf16 %v553_v40, %v551_v38 }
 0x213   :  { %v875_v44 = vpop.f32.mrb[2].mxu1  ;;  %1057 = vmatpush1.bf16.msra.mxu0 %v1056_v43 }
 0x214   :  { %v301_v45 = vpop.f32.mrb[3].mxu1  ;;  %v307_v54 = vadd.f32 %v875_v44, %v739_v30  ;;  %v555_v44 = vld [vmem:[#allocation7 + $0x20] sm:$0xff] }
 0x215   :  { %v302_v46 = vadd.f32 %v739_v30, %v301_v45  ;;  %v557_v45 = vld [vmem:[#allocation7 + $0x30] sm:$0xff] }
 0x217   :  { %v325_v48 = vsub.f32 %v302_v46, %v324_v47  ;;  %v560_v46 = vld [vmem:[#allocation7 + $0x48] sm:$0xff] }
 0x219   :  { %v326_v49 = vmul.f32 0.5, %v325_v48  ;;  %v1060_v48 = vpack.c.bf16 %v557_v45, %v555_v44 }
 0x21b   :  { %v327_v50 = vadd.f32 %v326_v49, %v324_v47  ;;  %v562_v47 = vld [vmem:[#allocation7 + $0x58] sm:$0xff] }
 0x21c   :  { %v1062_v49 = vpack.c.bf16 %v562_v47, %v560_v46 }
 0x21d   :  { %vm328_vm8 = vcmp.ge.f32.partialorder %v327_v50, 1.0 }
 0x21e   :  { %v746_v52 = vsel %vm328_vm8, 1.0, %v1226_v1  ;;  %911 = vmatprep.mubr.msk.f32.mxu0 %vm328_vm8, %v1227_v51 }
 0x21f   :  { %v331_v53 = vsub.f32 1.0, %v746_v52  ;;  %v564_v52 = vld [vmem:[#allocation7 + $0x68] sm:$0xff] }
 0x221   :  { %v332_v55 = vmul.f32 %v331_v53, %v327_v50  ;;  %v559_v50 = vld [vmem:[#allocation7 + $0x40] sm:$0xff]  ;;  %v566_v53 = vld [vmem:[#allocation7 + $0x78] sm:$0xff] }
 0x223   :  { %v333_v56 = vsub.f32 %v307_v54, %v332_v55 }
 0x225   :  { %v334_v57 = vmul.f32 0.5, %v333_v56  ;;  %v563_v56 = vld [vmem:[#allocation7 + $0x60] sm:$0xff] }
 0x227   :  { %v335_v58 = vadd.f32 %v334_v57, %v332_v55  ;;  %v1066_v55 = vpack.c.bf16 %v566_v53, %v564_v52  ;;  %v565_v57 = vld [vmem:[#allocation7 + $0x70] sm:$0xff] }
 0x228   :  { %v1068_v60 = vpack.c.bf16 %v565_v57, %v563_v56 }
 0x229   :  { %vm336_vm9 = vcmp.ge.f32.partialorder %v335_v58, 1.0  ;;  %v568_v58 = vld [vmem:[#allocation7 + $0x88] sm:$0xff] }
 0x22a   :  { %912 = vmatmul.mubr.msk.f32.gmra.mrb[4].mxu0 %vm336_vm9, %v1227_v51  ;;  %v1070_v61 = vpack.c.bf16 %v570_v59, %v568_v58 }
 0x22b   :  { %665 = vmatprep.mubr.f32.mxu0 %v1226_v1 }
 0x2e1   :  { %v910_v9 = vpop.f32.mrb[2].mxu0 }
 0x2e2   :  { %v409_v10 = vpop.f32.mrb[3].mxu0  ;;  %v415_v15 = vadd.f32 %v910_v9, %v748_v8  ;;  %v578_v9 = vld [vmem:[#allocation7 + $0xd8] sm:$0xff] }
 0x2e3   :  { %v410_v11 = vadd.f32 %v748_v8, %v409_v10 }
 0x2e5   :  { %v428_v12 = vmul.f32 0.5, %v410_v11  ;;  %v575_v11 = vld [vmem:[#allocation7 + $0xc0] sm:$0xff] }
 0x2e7   :  { %vm430_vm10 = vcmp.ge.f32.partialorder %v428_v12, 1.0 }
 0x2e8   :  { %v753_v13 = vsel %vm430_vm10, 1.0, %v1226_v1  ;;  %946 = vmatprep.mubr.msk.f32.mxu1 %vm430_vm10, %v1227_v51 }
 0x2e9   :  { %v433_v14 = vsub.f32 1.0, %v753_v13 }
 0x2eb   :  { %v434_v16 = vmul.f32 %v433_v14, %v428_v12  ;;  %v577_v12 = vld [vmem:[#allocation7 + $0xd0] sm:$0xff]  ;;  %v580_v14 = vld [vmem:[#allocation7 + $0xe8] sm:$0xff] }
 0x2ec   :  { %v1080_v13 = vpack.c.bf16 %v577_v12, %v575_v11 }
 0x2ed   :  { %v435_v17 = vsub.f32 %v415_v15, %v434_v16  ;;  %v582_v15 = vld [vmem:[#allocation7 + $0xf8] sm:$0xff] }
 0x2ef   :  { %v436_v18 = vmul.f32 0.5, %v435_v17  ;;  %v579_v17 = vld [vmem:[#allocation7 + $0xe0] sm:$0xff] }
 0x2f1   :  { %v437_v19 = vadd.f32 %v436_v18, %v434_v16  ;;  %v1082_v16 = vpack.c.bf16 %v582_v15, %v580_v14  ;;  %v581_v18 = vld [vmem:[#allocation7 + $0xf0] sm:$0xff] }
 0x2f3   :  { %vm438_vm11 = vcmp.ge.f32.partialorder %v437_v19, 1.0 }
 0x2f4   :  { %947 = vmatmul.mubr.msk.f32.vlgmr.msra.gmra.mrb[4].mxu1 %vm438_vm11, %v1227_v51  ;;  %v754_v20 = vsel %vm438_vm11, 1.0, %v1226_v1 }
 0x2f5   :  { %v441_v21 = vsub.f32 1.0, %v754_v20  ;;  %v757_v20 = vld [vmem:[#allocation5 + $0x1b8] ss:$0 sm:$0xff] }
 0x2f7   :  { %v442_v25 = vmul.f32 %v441_v21, %v437_v19  ;;  %v1084_v19 = vpack.c.bf16 %v581_v18, %v579_v17 }
 0x2fd   :  { %v913_v22 = vpop.f32.mrb[4].mxu0 }
 0x2fe   :  { %v419_v23 = vpop.f32.mrb[5].mxu0  ;;  %v425_v31 = vadd.f32 %v913_v22, %v748_v8 }
 0x2ff   :  { %v420_v24 = vadd.f32 %v748_v8, %v419_v23  ;;  %v576_v8 = vld [vmem:[#allocation7 + $0xc8] sm:$0xff] }
 0x300   :  { %v1078_v10 = vpack.c.bf16 %v578_v9, %v576_v8 }
 0x301   :  { %v443_v26 = vsub.f32 %v420_v24, %v442_v25 }
 0x303   :  { %v444_v27 = vmul.f32 0.5, %v443_v26 }
 0x305   :  { %v445_v28 = vadd.f32 %v444_v27, %v442_v25 }
 0x307   :  { %vm446_vm12 = vcmp.ge.f32.partialorder %v445_v28, 1.0 }
 0x308   :  { %v755_v29 = vsel %vm446_vm12, 1.0, %v1226_v1  ;;  %949 = vmatprep.mubr.msk.f32.mxu1 %vm446_vm12, %v1227_v51  ;;  %v1058_v1 = vpack.c.bf16 %v558_v42, %v556_v41 }
 0x309   :  { %v449_v30 = vsub.f32 1.0, %v755_v29 }
 0x30a   :  { %1059 = vmatprep.subr.bf16.mxu0 %v1058_v1 }
 0x30b   :  { %v450_v32 = vmul.f32 %v449_v30, %v445_v28  ;;  %1061 = vmatpush1.bf16.msra.mxu0 %v1060_v48 }
 0x30c   :  { %1063 = vmatprep.subr.bf16.mxu0 %v1062_v49 }
 0x30d   :  { %v451_v33 = vsub.f32 %v425_v31, %v450_v32 }
 0x30f   :  { %v452_v34 = vmul.f32 0.5, %v451_v33 }
 0x311   :  { %v453_v35 = vadd.f32 %v452_v34, %v450_v32  ;;  %v589_v34 = vlaneseq }
 0x313   :  { %vm454_vm13 = vcmp.ge.f32.partialorder %v453_v35, 1.0  ;;  %v590_v35 = vshrl.u32 %v589_v34, 7 }
 0x314   :  { %950 = vmatmul.mubr.msk.f32.gmra.mrb[6].mxu1 %vm454_vm13, %v1227_v51  ;;  %v561_v51 = vld [vmem:[#allocation7 + $0x50] sm:$0xff] }
 0x315   :  { %v1064_v54 = vpack.c.bf16 %v561_v51, %v559_v50  ;;  %v591_v36 = vsub.s32 0, %v590_v35  ;;  %v595_v38 = vsub.s32 1, %v590_v35  ;;  %v680_v50 = vand.u32 127, %v589_v34 }
 0x317   :  { %1065 = vmatpush1.bf16.msra.mxu0 %v1064_v54  ;;  %v592_v39 = vrot.slane %v584_v37, %v591_v36  ;;  %v596_v40 = vrot.slane %v584_v37, %v595_v38  ;;  %v681_v51 = vadd.s32 128, %v680_v50 }
 0x318   :  { %1067 = vmatprep.subr.bf16.mxu0 %v1066_v55 }
 0x31b   :  { %1069 = vmatpush1.bf16.msra.mxu0 %v1068_v60 }
 0x31c   :  { %1071 = vmatprep.subr.bf16.mxu0 %v1070_v61 }
 0x31f   :  { %1073 = vmatpush1.bf16.msra.mxu0 %v1072_v3 }
 0x320   :  { %1075 = vmatprep.subr.bf16.mxu0 %v1074_v4 }
 0x323   :  { %1077 = vmatpush1.bf16.msra.mxu0 %v1076_v7 }
 0x324   :  { %1079 = vmatprep.subr.bf16.mxu0 %v1078_v10 }
 0x327   :  { %1081 = vmatpush1.bf16.msra.mxu0 %v1080_v13 }
 0x328   :  { %1083 = vmatprep.subr.bf16.mxu0 %v1082_v16 }
 0x32b   :  { %1085 = vmatpush1.bf16.msra.mxu0 %v1084_v19 }
 0x3c7   :  { %v948_v21 = vpop.f32.mrb[4].mxu1 }
 0x3c8   :  { %v533_v22 = vadd.f32 %v948_v21, %v757_v20  ;;  %v527_v23 = vpop.f32.mrb[5].mxu1 }
 0x3c9   :  { %v528_v24 = vadd.f32 %v757_v20, %v527_v23 }
 0x3cb   :  { %v546_v25 = vadd.f32 %v533_v22, %v528_v24 }
 0x3e7   :  { %v951_v26 = vpop.f32.mrb[6].mxu1 }
 0x3e8   :  { %v537_v27 = vpop.f32.mrb[7].mxu1  ;;  %v543_v29 = vadd.f32 %v951_v26, %v757_v20 }
 0x3e9   :  { %v538_v28 = vadd.f32 %v757_v20, %v537_v27 }
 0x3eb   :  { %v547_v30 = vadd.f32 %v546_v25, %v538_v28 }
 0x3ed   :  { %v548_v31 = vadd.f32 %v547_v30, %v543_v29 }
 0x3ef   :  { %v549_v32 = vmul.f32 0.25, %v548_v31 }
 0x3f1   :  { %550 = vst [vmem:[#allocation8] sm:$0xff] %v549_v32  ;;  %666 = vmatmul.mubr.f32.vlgmr.msra.gmra.mrb[6].mxu0 %v549_v32  ;;  %v585_v33 = vmul.f32 %v549_v32, %v549_v32 }
 0x3f3   :  { %586 = vadd.xlane.f32.xlu0 %v585_v33 }
 0x480   :  { %v587_v41 = vpop.xlane.xlu0 %586 }
 0x481   :  { %v599_v43 = vadd.f32 %v592_v39, %v587_v41  ;;  %v600_v45 = vadd.f32 %v596_v40, %v587_v41 }
 0x4c4   :  { %v667_v42 = vpop.f32.mrb[6].mxu0 }
 0x4c5   :  { %v672_v1 = vmul.f32 2.0, %v667_v42  ;;  %v669_v44 = vpop.f32.mrb[7].mxu0 }
 0x4c6   :  { %v673_v46 = vmul.f32 2.0, %v669_v44 }
 0x4c7   :  { %v674_v47 = vsub.f32 %v599_v43, %v672_v1 }
 0x4c8   :  { %v675_v48 = vsub.f32 %v600_v45, %v673_v46 }
 0x4ca   :  { %v676_v49 = vmin.f32 %v674_v47, %v675_v48 }
 0x4cc   :  { %677 = vmin.xlane.f32.xlu0 %v676_v49 }
 0x559   :  { %v678_v52 = vpop.xlane.xlu0 %677 }
 0x55a   :  { %vm682_vm14 = vcmp.le.f32.partialorder %v674_v47, %v678_v52  ;;  %vm683_vm15 = vcmp.le.f32.partialorder %v675_v48, %v678_v52 }
 0x55b   :  { %v684_v53 = vsel %vm682_vm14, %v680_v50, 2147483647  ;;  %v685_v54 = vsel %vm683_vm15, %v681_v51, 2147483647 }
 0x55c   :  { %vm686_vm0 = vcmp.lt.s32.totalorder %v684_v53, %v685_v54 }
 0x55d   :  { %v687_v55 = vsel %vm686_vm0, %v684_v53, %v685_v54 }
 0x55e   :  { %v689_v56 = vshra.s32 %v687_v55, 16  ;;  %v688_v58 = vand.u32 65535, %v687_v55 }
 0x560   :  { %v691_v57 = vcvt.s32.f32 %v689_v56  ;;  %v690_v60 = vcvt.s32.f32 %v688_v58 }
 0x562   :  { %692 = vmin.xlane.f32.xlu1 %v691_v57 }
 0x5ef   :  { %v693_v59 = vpop.xlane.xlu1 %692 }
 0x5f0   :  { %vm694_vm1 = vcmp.eq.f32.partialorder %v691_v57, %v693_v59 }
 0x5f1   :  { %v695_v61 = vsel %vm694_vm1, %v690_v60, inf }
 0x5f2   :  { %696 = vmin.xlane.f32.xlu1 %v695_v61 }
 0x5f3   :  { %1176 = shalt.err (!%p1173_p0)
}
 0x5f4   :  { %s1177_s5 = scalar_lea.hbm %s1341_s3, 128 }
 0x5f5   :  { %p1178_p1 = scmp.ne.s32.totalorder %s1341_s3, %s1177_s5  ;;  %p1181_p2 = scmp.lt.u32.totalorder %s1177_s5, %s1341_s3 }
 0x5f7   :  { %p1183_p3 = pnand %p1181_p2, %p1178_p1 }
 0x5f9   :  { %1186 = shalt.err (!%p1183_p3)
}
 0x5fa   :  { %712 = dma.vmem_to_hbm [thread:$0]  %s710_s27, 128, %s1341_s3, [#allocation4]   ;;  %v699_v62 = vcvt.f32.s32 %v693_v59 }
 0x5fb   :  { %s1229_s12 = smov [#allocation9]  }
 0x5fc   :  { %s719_s13 = sshll.u32 %s1229_s12, 4  ;;  %v700_v0 = vshll.u32 %v699_v62, 16  ;;  %s720_s13 = int_to_ptr.vmem [resolvable:$true] %s719_s13 }
 0x5fd   :  { %s1187_s1 = scalar_lea.vmem %s720_s13, 128  ;;  %p1192_p5 = scmp.lt.s32.totalorder %s720_s13, %s720_s13 }
 0x5fe   :  { %p1188_p4 = scmp.ne.s32.totalorder %s720_s13, %s1187_s1  ;;  %p1193_p6 = scmp.lt.s32.totalorder %s1187_s1, %s1187_s1 }
 0x600   :  { %p1194_p7 = por %p1193_p6, %p1192_p5 }
 0x602   :  { %p1195_p8 = pnand %p1194_p7, %p1188_p4 }
 0x67f   :  { %v697_v63 = vpop.xlane.xlu1 %696 }
 0x680   :  { %v698_v2 = vcvt.f32.s32 %v697_v63 }
 0x682   :  { %v701_v3 = vadd.s32 %v700_v0, %v698_v2 }
 0x684   :  { %702 = vst [vmem:[#allocation9] sm:$0xff] %v701_v3 }
 0x685   :  { %1198 = shalt.err (!%p1195_p8)
}
 0x686   :  { %s1199_s3 = scalar_lea.hbm %s1342_s4, 128 }
 0x687   :  { %p1200_p9 = scmp.ne.s32.totalorder %s1342_s4, %s1199_s3  ;;  %p1203_p10 = scmp.lt.u32.totalorder %s1199_s3, %s1342_s4 }
 0x689   :  { %p1205_p11 = pnand %p1203_p10, %p1200_p9 }
 0x68b   :  { %1208 = shalt.err (!%p1205_p11)
}
 0x68c   :  { %722 = dma.vmem_to_hbm [thread:$0]  %s720_s13, 128, %s1342_s4, [#allocation10]  }
 0x68d   :  { %1213 = dma.done.wait [#allocation4], 128  }
 0x68e   :  { %1214 = vsyncadd [#allocation4], 4294967168 }
 0x68f   :  { %1215 = dma.done.wait [#allocation10], 128  }
 0x690   :  { %1216 = vsyncadd [#allocation10], 4294967168 }
 0x691   :  { %729 = vsyncpa [#allocation3], 1 }
 0x692   :  { %730 = vsyncpa [#allocation6], 1 }
 0x693   :  { %731 = vsyncpa [#allocation4], 1 }
 0x694   :  { %732 = vsyncpa [#allocation10], 1 }

</bundles_post_ra>
